<compile_context>
chip_gen: v7x
topology: tpu7x:2x2x1
jax: 0.10.0
libtpu: 0.0.40
codegen_flags: <defaults>
</compile_context>

<pallas_src>
import jax
import jax.numpy as jnp
from jax.experimental import pallas as pl
from jax.experimental.pallas import tpu as pltpu


def esn_kernel(x_ref, win_ref, scal_ref, o_ref):
    """One batch tile of the fused 3-layer ESN forward.

    x_ref:    (B_TILE, I) f32 VMEM  -- streamed input tile (original layout)
    win_ref:  (1, I)      f32 VMEM  -- input-layer weight row, grid-resident
    scal_ref: (3,)        f32 SMEM  -- packed scalars [w_hidden, b_hidden, w_out]
    o_ref:    (B_TILE, 1) f32 VMEM  -- output tile
    """
    # Layer 1: Linear(I -> 1, no bias) + tanh.
    prod = x_ref[...] * win_ref[...]                        # VPU (sublane bcast)
    h1 = jnp.tanh(jnp.sum(prod, axis=1, keepdims=True))     # XLU lane reduce + EUP
    # Layer 2: Linear(1 -> 1, bias=True) + tanh; scalar operands from SMEM.
    wh = scal_ref[0]
    bh = scal_ref[1]
    wout = scal_ref[2]
    h2 = jnp.tanh(h1 * wh + bh)                             # VPU + EUP
    # Layer 3: Linear(1 -> 1, no bias).
    o_ref[...] = h2 * wout                                  # VPU


def esn_forward(x, w_in, w_hidden, b_hidden, w_out, *, b_tile=512):
    """x: (B, input_size) float32.

    PyTorch Linear parameter layouts (out, in):
      w_in:     (reservoir_size, input_size)   = (1, I)
      w_hidden: (reservoir_size, reservoir_size) = (1, 1)
      b_hidden: (reservoir_size,)              = (1,)
      w_out:    (hidden_size, reservoir_size)  = (1, 1)
    Returns (B, hidden_size) float32.
    """
    B, I = x.shape
    R = w_in.shape[0]
    H = w_out.shape[0]
    # The fused VPU-only kernel is specialised to the module constants R=H=1.
    assert R == 1 and H == 1, "kernel specialised to reservoir_size=hidden_size=1"

    f32 = jnp.float32
    x = x.astype(f32)
    win = jnp.reshape(w_in, (1, I)).astype(f32)              # free reshape (R=1)
    scal = jnp.concatenate([                                  # [wh, bh, wout]
        jnp.reshape(w_hidden, (1,)),
        jnp.reshape(b_hidden, (1,)),
        jnp.reshape(w_out, (1,)),
    ]).astype(f32)

    # Batch lives on the sublane axis: pad to a multiple of 8 and tile it.
    # Default tile = 512 rows -> (512, I) f32 block, lane-padded to ~256 KiB in
    # VMEM, double-buffered: well under the scoped-VMEM default on every
    # generation (16 MiB v5e / 32 MiB v6e / 32 MiB v7x).
    b_pad = ((B + 7) // 8) * 8
    bt = max(8, (min(b_tile, b_pad) // 8) * 8)
    n_tiles = pl.cdiv(b_pad, bt)
    b_pad = n_tiles * bt
    if b_pad != B:
        x = jnp.pad(x, ((0, b_pad - B), (0, 0)))             # zero rows, sliced off below

    # Advisory cost hint so XLA schedules neighbouring ops around this small,
    # mem-bound custom call.
    cost = pl.CostEstimate(
        flops=2 * B * (I * R + R * R + R * H),
        transcendentals=2 * B * R,
        bytes_accessed=4 * (B * I + I * R + 3 + B * H),
    )

    out = pl.pallas_call(
        esn_kernel,
        out_shape=jax.ShapeDtypeStruct((b_pad, 1), f32),
        grid=(n_tiles,),
        in_specs=[
            pl.BlockSpec((bt, I), lambda i: (i, 0)),          # streamed batch tile
            pl.BlockSpec((1, I), lambda i: (0, 0)),           # resident weight row
            pl.BlockSpec(memory_space=pltpu.SMEM),            # packed scalar params
        ],
        out_specs=pl.BlockSpec((bt, 1), lambda i: (i, 0)),
        compiler_params=pltpu.CompilerParams(
            dimension_semantics=("parallel",),                # 2-TC sharding on v7x
        ),
        cost_estimate=cost,
    )(x, win, scal)

    # Drop batch padding; output is already (B, 1) == (B, hidden_size).
    return out[:B]


def esn_reference(x, w_in, w_hidden, b_hidden, w_out):
    h = jnp.tanh(x @ w_in.T)
    h = jnp.tanh(h @ w_hidden.T + b_hidden)
    return h @ w_out.T


if __name__ == "__main__":
    # Module constants (from the reference script): reservoir_size = hidden_size = 1;
    # input_size comes from the data columns — pick a small deterministic value.
    batch = 8
    input_size = 16
    reservoir_size = 1
    hidden_size = 1

    key = jax.random.PRNGKey(0)
    k_x, k_win, k_wh, k_bh, k_wout, k_x2 = jax.random.split(key, 6)

    x = jax.random.normal(k_x, (batch, input_size), dtype=jnp.float32)
    # Deterministic synthetic parameter init (PyTorch Linear layout: (out, in)).
    w_in = jax.random.uniform(k_win, (reservoir_size, input_size),
                              minval=-0.25, maxval=0.25, dtype=jnp.float32)
    w_hidden = jax.random.uniform(k_wh, (reservoir_size, reservoir_size),
                                  minval=-1.0, maxval=1.0, dtype=jnp.float32)
    b_hidden = jax.random.uniform(k_bh, (reservoir_size,),
                                  minval=-1.0, maxval=1.0, dtype=jnp.float32)
    w_out = jax.random.uniform(k_wout, (hidden_size, reservoir_size),
                               minval=-1.0, maxval=1.0, dtype=jnp.float32)

    # Small shape (single tile).
    out = jax.block_until_ready(esn_forward(x, w_in, w_hidden, b_hidden, w_out))
    ref = esn_reference(x, w_in, w_hidden, b_hidden, w_out)
    assert out.shape == (batch, hidden_size)
    assert jnp.allclose(out, ref, atol=1e-5, rtol=1e-5), (out, ref)

    # Non-multiple-of-tile batch: exercises batch padding + a 2-tile grid.
    x2 = jax.random.normal(k_x2, (200, input_size), dtype=jnp.float32)
    out2 = jax.block_until_ready(
        esn_forward(x2, w_in, w_hidden, b_hidden, w_out, b_tile=128))
    ref2 = esn_reference(x2, w_in, w_hidden, b_hidden, w_out)
    assert out2.shape == (200, hidden_size)
    assert jnp.allclose(out2, ref2, atol=1e-5, rtol=1e-5)

    print("KERNEL_OK")
</pallas_src>

<mosaic_0001>
module attributes {stable_mosaic.version = 11 : i64} {
  func.func @esn_kernel(%arg0: i32, %arg1: memref<8x16xf32, #tpu.memory_space<vmem>>, %arg2: memref<1x16xf32, #tpu.memory_space<vmem>>, %arg3: memref<3xf32, #tpu.memory_space<smem>>, %arg4: memref<8x1xf32, #tpu.memory_space<vmem>>) attributes {dimension_semantics = [#tpu.dimension_semantics<parallel>], iteration_bounds = array<i64: 1>, scalar_prefetch = 0 : i64, scratch_operands = 0 : i64, tpu.core_type = #tpu.core_type<tc>, window_params = [{transform_indices = @transform_0, window_bounds = array<i64: 8, 16>}, {pipeline_mode = #tpu.pipeline_mode<synchronous>, transform_indices = @transform_1, window_bounds = array<i64: 1, 16>}, {transform_indices = @transform_2, window_bounds = array<i64: 3>}, {transform_indices = @transform_3, window_bounds = array<i64: 8, 1>}]} {
    %c0 = arith.constant 0 : index
    %c0_0 = arith.constant 0 : index
    %0 = vector.load %arg1[%c0, %c0_0] : memref<8x16xf32, #tpu.memory_space<vmem>>, vector<8x16xf32>
    %c0_1 = arith.constant 0 : index
    %c0_2 = arith.constant 0 : index
    %1 = vector.load %arg2[%c0_1, %c0_2] : memref<1x16xf32, #tpu.memory_space<vmem>>, vector<1x16xf32>
    %2 = vector.broadcast %1 : vector<1x16xf32> to vector<8x16xf32>
    %3 = arith.mulf %0, %2 : vector<8x16xf32>
    %cst = arith.constant dense<0.000000e+00> : vector<8xf32>
    %4 = vector.multi_reduction <add>, %3, %cst [1] : vector<8x16xf32> to vector<8xf32>
    %5 = vector.shape_cast %4 : vector<8xf32> to vector<8x1xf32>
    %6 = math.tanh %5 : vector<8x1xf32>
    %c0_3 = arith.constant 0 : index
    %7 = memref.load %arg3[%c0_3] : memref<3xf32, #tpu.memory_space<smem>>
    %c1 = arith.constant 1 : index
    %8 = memref.load %arg3[%c1] : memref<3xf32, #tpu.memory_space<smem>>
    %c2 = arith.constant 2 : index
    %9 = memref.load %arg3[%c2] : memref<3xf32, #tpu.memory_space<smem>>
    %10 = vector.broadcast %7 : f32 to vector<8x1xf32>
    %11 = arith.mulf %6, %10 : vector<8x1xf32>
    %12 = vector.broadcast %8 : f32 to vector<8x1xf32>
    %13 = arith.addf %11, %12 : vector<8x1xf32>
    %14 = math.tanh %13 : vector<8x1xf32>
    %15 = vector.broadcast %9 : f32 to vector<8x1xf32>
    %16 = arith.mulf %14, %15 : vector<8x1xf32>
    %c0_4 = arith.constant 0 : index
    %c0_5 = arith.constant 0 : index
    %17 = vector.load %arg4[%c0_4, %c0_5] : memref<8x1xf32, #tpu.memory_space<vmem>>, vector<8x1xf32>
    tpu.vector_store %arg4[%c0_4, %c0_5], %16 {strides = array<i32>} : memref<8x1xf32, #tpu.memory_space<vmem>>, vector<8x1xf32>,
    return
  }
  func.func @transform_0(%arg0: i32) -> (i32, i32) {
    %c0_i32 = arith.constant 0 : i32
    %c0_i32_0 = arith.constant 0 : i32
    return %arg0, %c0_i32 : i32, i32
  }
  func.func @transform_1(%arg0: i32) -> (i32, i32) {
    %c0_i32 = arith.constant 0 : i32
    %c0_i32_0 = arith.constant 0 : i32
    %c0_i32_1 = arith.constant 0 : i32
    return %c0_i32, %c0_i32_0 : i32, i32
  }
  func.func @transform_2(%arg0: i32) -> i32 {
    %c0_i32 = arith.constant 0 : i32
    %c0_i32_0 = arith.constant 0 : i32
    return %c0_i32 : i32
  }
  func.func @transform_3(%arg0: i32) -> (i32, i32) {
    %c0_i32 = arith.constant 0 : i32
    %c0_i32_0 = arith.constant 0 : i32
    return %arg0, %c0_i32 : i32, i32
  }
}

</mosaic_0001>

<bundles_post_ra>
// kernel: tpu_custom_call.1
= control target key start
LH: loop header
LB: loop body
LE: loop exit
PB: predicated region body
PF: predicated region fallthrough
CT: control target
= control target key end

     0   :  { %8 = vsyncpa [#allocation3], 0  ;;  %s161_s0 = inlined_call_operand.hbm [shape: f32[8,16], index: 0, kind: input, shape index: {}]   ;;  %s162_s1 = inlined_call_operand.vmem [shape: f32[1,16], index: 1, kind: input, shape index: {}]   ;;  %s163_s2 = inlined_call_operand.vmem [shape: f32[3], index: 2, kind: input, shape index: {}]   ;;  %s164_s3 = inlined_call_operand.vmem [shape: f32[8,1], index: 3, kind: output, shape index: {}]  }
   0x1   :  { %9 = vsyncpa [#allocation4], 0  ;;  %s28_s14 = sshll.u32 %s163_s2, 4  ;;  %s118_s15 = smov [#allocation2]   ;;  %s29_s14 = int_to_ptr.vmem [resolvable:$true] %s28_s14 }
   0x2   :  { %s16_s16 = sshll.u32 %s118_s15, 4  ;;  %s80_s19 = scalar_lea.hbm %s161_s0, 128  ;;  %s17_s16 = int_to_ptr.vmem [resolvable:$true] %s16_s16 }
   0x3   :  { %p81_p0 = scmp.ne.s32.totalorder %s161_s0, %s80_s19  ;;  %p84_p1 = scmp.lt.u32.totalorder %s80_s19, %s161_s0 }
   0x5   :  { %p86_p2 = pnand %p84_p1, %p81_p0 }
   0x7   :  { %89 = shalt.err (!%p86_p2)
}
   0x8   :  { %s90_s24 = scalar_lea.vmem %s17_s16, 128  ;;  %p95_p4 = scmp.lt.s32.totalorder %s17_s16, %s17_s16 }
   0x9   :  { %p91_p3 = scmp.ne.s32.totalorder %s17_s16, %s90_s24  ;;  %p96_p5 = scmp.lt.s32.totalorder %s90_s24, %s90_s24 }
   0xb   :  { %p97_p6 = por %p96_p5, %p95_p4 }
   0xd   :  { %p98_p7 = pnand %p97_p6, %p91_p3 }
   0xf   :  { %101 = shalt.err (!%p98_p7)
}
  0x10   :  { %19 = dma.hbm_to_vmem [thread:$0]  %s161_s0, 128, %s17_s16, [#allocation3]  }
  0x11   :  { %s102_s26 = scalar_lea.vmem %s29_s14, 16  ;;  %p107_p9 = scmp.lt.s32.totalorder %s29_s14, %s29_s14 }
  0x12   :  { %p103_p8 = scmp.ne.s32.totalorder %s29_s14, %s102_s26  ;;  %p108_p10 = scmp.lt.s32.totalorder %s102_s26, %s102_s26 }
  0x14   :  { %p109_p11 = por %p108_p10, %p107_p9 }
  0x16   :  { %p110_p12 = pnand %p109_p11, %p103_p8 }
  0x18   :  { %113 = shalt.err (!%p110_p12)
}
  0x19   :  { %s119_s27 = smov [#allocation5]  }
  0x1a   :  { %31 = dma.vmem_to_smem %s29_s14, 16, %s119_s27, [#allocation4]  }
  0x1b   :  { %114 = dma.done.wait [#allocation3], 128  }
  0x1c   :  { %115 = vsyncadd [#allocation3], 4294967168 }
  0x1d   :  { %116 = dma.done.wait [#allocation4], 16  }
  0x1e   :  { %117 = vsyncadd [#allocation4], 4294967280 }
  0x1f   :  { %38 = sfence }
  0x20   :  { %v39_v0 = vld [vmem:[#allocation2] sm:$0xff]  ;;  %v71_v1 = vld [vmem:[%s162_s1] ss:$0 sm:$0xff]  ;;  %vm48_vm0 = vcmask 130048   ;;  %s53_s0 = sld [smem:[#allocation5]]  ;;  %s72_s30 = sld [smem:[#allocation5 + $0x1]] }
  0x21   :  { %v47_v2 = vmul.f32 %v71_v1, %v39_v0  ;;  %s73_s4 = sld [smem:[#allocation5 + $0x2]]  ;;  %vm63_vm1 = vcmask 7168  }
  0x23   :  { %v49_v3 = vsel %vm48_vm0, %v47_v2, 0.0 }
  0x24   :  { %50 = vadd.xlane.f32.xlu0 %v49_v3 }
  0x26   :  { %v56_v5 = vstv %s53_s0  ;;  %v58_v7 = vstv %s72_s30 }
  0x27   :  { %v61_v10 = vstv %s73_s4 }
  0xb1   :  { %v51_v4 = vpop.xlane.xlu0 %50 }
  0xb2   :  { %76 = vtanh.f32 %v51_v4 }
  0xbc   :  { %v77_v6 = vpop.eup %76 }
  0xbd   :  { %v57_v8 = vmul.f32 %v77_v6, %v56_v5 }
  0xbf   :  { %v59_v9 = vadd.f32 %v58_v7, %v57_v8 }
  0xc1   :  { %78 = vtanh.f32 %v59_v9 }
  0xcb   :  { %v79_v11 = vpop.eup %78 }
  0xcc   :  { %v62_v12 = vmul.f32 %v79_v11, %v61_v10 }
  0xce   :  { %64 = vst.msk [vmem:[%s164_s3] sm:$0xff] %vm63_vm1, %v62_v12 }
  0xcf   :  { %69 = vsyncpa [#allocation3], 1 }
  0xd0   :  { %70 = vsyncpa [#allocation4], 1 }

</bundles_post_ra>
